<compile_context>
chip_gen: v6e
topology: v6e:2x2x1
jax: 0.10.0
libtpu: 0.0.40
codegen_flags: <defaults>
</compile_context>

<pallas_src>
import math
from functools import partial

import jax
import jax.numpy as jnp
from jax.experimental import pallas as pl
from jax.experimental.pallas import tpu as pltpu

LANES = 128
_INV_SQRT2 = 0.7071067811865476


def _round_up(a: int, b: int) -> int:
    return (a + b - 1) // b * b


# ----------------------------------------------------------------------------
# In-kernel GELU, exact-erf form (nn.GELU() default), via the A&S 7.1.26
# rational approximation of erf (|err| < 1.5e-7).  NOTE the 1/sqrt(2) scaling.
# ----------------------------------------------------------------------------
def _gelu_exact(x):
    z = x * _INV_SQRT2
    s = jnp.where(z < 0.0, -1.0, 1.0)
    az = jnp.abs(z)
    t = 1.0 / (1.0 + 0.3275911 * az)
    poly = ((((1.061405429 * t - 1.453152027) * t + 1.421413741) * t
             - 0.284496736) * t + 0.254829592) * t
    erf = s * (1.0 - poly * jnp.exp(-az * az))
    return 0.5 * x * (1.0 + erf)


# ----------------------------------------------------------------------------
# Fused kernel, grid = (phase, tile).  Transposed layout: lanes carry B*D.
#   phase 0: accumulate BN sum / sumsq of h^T = We^T @ x^T into VMEM scratch
#   phase 1 (tile 0): fold stats into per-feature scale/shift
#   phase 1: BN affine -> MLP1 -> residual -> linear_final, write y^T
# vec_ref columns: 0 = gamma, 1 = beta, 2 = b1, 3 = b2, 4 = bf (rows 0:out_pad)
# wstk_ref rows:   [0:dm] = W1, [dm:2dm] = W2, [2dm:2dm+out_pad] = Wf (padded)
# ----------------------------------------------------------------------------
def _fused_kernel(xT_ref, weT_ref, wstk_ref, vec_ref, o_ref,
                  ssum_ref, ssq_ref, scale_ref, shift_ref,
                  *, dm, out_pad, n_real, eps):
    phase = pl.program_id(0)
    tile = pl.program_id(1)

    @pl.when((phase == 0) & (tile == 0))
    def _():
        ssum_ref[...] = jnp.zeros_like(ssum_ref)
        ssq_ref[...] = jnp.zeros_like(ssq_ref)

    # embed Linear (bias folded away; BN mean-subtraction cancels it exactly)
    h = jnp.dot(weT_ref[...], xT_ref[...],
                preferred_element_type=jnp.float32)          # (dm, tile_n) f32

    @pl.when(phase == 0)
    def _():
        ssum_ref[...] += jnp.sum(h, axis=1, keepdims=True)
        ssq_ref[...] += jnp.sum(h * h, axis=1, keepdims=True)

    @pl.when(phase == 1)
    def _():
        @pl.when(tile == 0)
        def _():
            inv_n = 1.0 / n_real
            mean = ssum_ref[...] * inv_n
            var = jnp.maximum(ssq_ref[...] * inv_n - mean * mean, 0.0)
            inv_std = jax.lax.rsqrt(var + eps)
            gamma = vec_ref[:, 0:1]
            beta = vec_ref[:, 1:2]
            sc = gamma * inv_std
            scale_ref[...] = sc
            shift_ref[...] = beta - mean * sc

        # BatchNorm1d (training-mode batch stats) as a per-feature affine
        hb = h * scale_ref[...] + shift_ref[...]              # (dm, tile_n) f32

        w1 = wstk_ref[0:dm, :]
        w2 = wstk_ref[dm:2 * dm, :]
        wf = wstk_ref[2 * dm:2 * dm + out_pad, :]
        b1 = vec_ref[:, 2:3]
        b2 = vec_ref[:, 3:4]
        bf = vec_ref[0:out_pad, 4:5]

        # MLP1: Linear -> GELU -> Linear (bf16 MXU operands, f32 accumulate)
        m = jnp.dot(w1, hb.astype(w1.dtype), preferred_element_type=jnp.float32) + b1
        m = _gelu_exact(m)
        m = jnp.dot(w2, m.astype(w2.dtype), preferred_element_type=jnp.float32) + b2

        # residual (Dropout(p=0.0) is identity)
        hidden = hb + m

        # linear_final, written transposed: (out_pad, tile_n), dense sublanes
        y = jnp.dot(wf, hidden.astype(wf.dtype), preferred_element_type=jnp.float32) + bf
        o_ref[...] = y.astype(o_ref.dtype)


# ----------------------------------------------------------------------------
# Wrapper: parameters, "filter" rearranges, pallas_call glue.
# ----------------------------------------------------------------------------
class FrequencyPredictorPallas:
    def __init__(self, data_dim, in_len, out_len, hop_len=3, d_model=32,
                 max_tile_n=4096, key=None):
        self.data_dim = data_dim
        self.in_len = in_len + (hop_len - in_len % hop_len) % hop_len
        self.out_len = out_len
        self.d_model = d_model
        self.max_tile_n = max_tile_n
        # identity "filter": in_seg_num = in_len, out_seg_num = out_len
        self.in_seg_num = self.in_len
        self.out_seg_num = self.out_len
        self.out_pad = _round_up(self.out_seg_num, 8)
        assert d_model % 8 == 0
        assert self.out_pad <= d_model

        key = jax.random.PRNGKey(0) if key is None else key

        def lin_init(k, fan_in, fan_out):
            # PyTorch nn.Linear default init, weight stored (out, in) = already
            # the orientation needed for y^T = W @ x^T.
            bound = 1.0 / math.sqrt(fan_in)
            kw, kb = jax.random.split(k)
            w = jax.random.uniform(kw, (fan_out, fan_in), jnp.float32, -bound, bound)
            b = jax.random.uniform(kb, (fan_out,), jnp.float32, -bound, bound)
            return w, b

        k0, k1, k2, k3 = jax.random.split(key, 4)
        dm = d_model
        self.weT_f32, _ = lin_init(k0, self.in_seg_num, dm)          # (dm, s_in), bias dropped
        self.gamma = jnp.ones((dm, 1), jnp.float32)                  # BN weight (default)
        self.beta = jnp.zeros((dm, 1), jnp.float32)                  # BN bias   (default)
        self.w1_f32, self.b1_f32 = lin_init(k1, dm, dm)
        self.w2_f32, self.b2_f32 = lin_init(k2, dm, dm)
        self.wf_f32, self.bf_f32 = lin_init(k3, dm, self.out_seg_num)

        # ---- kernel operands -------------------------------------------------
        self.weT_bf = self.weT_f32.astype(jnp.bfloat16)
        wf_pad = jnp.zeros((self.out_pad, dm), jnp.float32).at[:self.out_seg_num].set(self.wf_f32)
        self.wstk_bf = jnp.concatenate([self.w1_f32, self.w2_f32, wf_pad],
                                       axis=0).astype(jnp.bfloat16)   # (2dm+out_pad, dm)
        vec = jnp.zeros((dm, 8), jnp.float32)
        vec = vec.at[:, 0].set(1.0)                                   # gamma
        vec = vec.at[:, 2].set(self.b1_f32)
        vec = vec.at[:, 3].set(self.b2_f32)
        vec = vec.at[:self.out_seg_num, 4].set(self.bf_f32)
        self.vec = vec                                                # (dm, 8) f32

    def __call__(self, x_seq):
        B, L, D = x_seq.shape
        assert L == self.in_len, "x_seq length must equal padded in_len"
        dm, s_in, out_pad = self.d_model, self.in_seg_num, self.out_pad
        n = B * D

        # filter.input_rearrange (identity placeholder), transposed: (s_in, B*D)
        xT = jnp.transpose(x_seq, (1, 0, 2)).reshape(L, n).astype(jnp.float32)

        # lane tiling: B*D on the 128-lane axis; zero-padded lanes add 0 to the
        # BN sums and their outputs are discarded by output_rearrange.
        tile_n = min(self.max_tile_n, _round_up(n, LANES))
        n_pad = _round_up(n, tile_n)
        if n_pad != n:
            xT = jnp.pad(xT, ((0, 0), (0, n_pad - n)))
        xT = xT.astype(jnp.bfloat16)
        num_tiles = n_pad // tile_n

        kernel = partial(_fused_kernel, dm=dm, out_pad=out_pad, n_real=n, eps=1e-5)

        out = pl.pallas_call(
            kernel,
            out_shape=jax.ShapeDtypeStruct((out_pad, n_pad), jnp.float32),
            grid=(2, num_tiles),
            in_specs=[
                pl.BlockSpec((s_in, tile_n), lambda p, i: (0, i)),
                pl.BlockSpec((dm, s_in), lambda p, i: (0, 0)),
                pl.BlockSpec((2 * dm + out_pad, dm), lambda p, i: (0, 0)),
                pl.BlockSpec((dm, 8), lambda p, i: (0, 0)),
            ],
            # Output parks at block 0 during phase 0 (never written there) and
            # follows the tile index in phase 1, so no garbage writebacks occur.
            out_specs=pl.BlockSpec((out_pad, tile_n), lambda p, i: (0, i * p)),
            scratch_shapes=[pltpu.VMEM((dm, 1), jnp.float32)] * 4,   # sum, sumsq, scale, shift
            compiler_params=pltpu.CompilerParams(
                dimension_semantics=("arbitrary", "arbitrary"),
                vmem_limit_bytes=32 * 1024 * 1024),
        )(xT, self.weT_bf, self.wstk_bf, self.vec)

        # filter.output_rearrange: (out_seg_num, B*D) -> (B, out_len, D)
        yT = out[:self.out_seg_num, :n]
        return jnp.transpose(yT.reshape(self.out_seg_num, B, D), (1, 0, 2))


# ----------------------------------------------------------------------------
# Pure-JAX references (same parameters, same transposed math).
#   emulate_bf16=True  -> rounds every matmul operand to bf16 (what the kernel
#                         does on the MXU); used for a tight check.
#   emulate_bf16=False -> full-f32 matmuls; loose precision sanity check.
# ----------------------------------------------------------------------------
def _reference(model, x_seq, emulate_bf16):
    B, L, D = x_seq.shape
    n = B * D
    xT = jnp.transpose(x_seq, (1, 0, 2)).reshape(L, n).astype(jnp.float32)

    if emulate_bf16:
        def mm(a, b):
            return jnp.dot(a.astype(jnp.bfloat16), b.astype(jnp.bfloat16),
                           preferred_element_type=jnp.float32)
    else:
        def mm(a, b):
            return jnp.dot(a, b, preferred_element_type=jnp.float32)

    h = mm(model.weT_f32, xT)                                          # (dm, n)
    mean = jnp.mean(h, axis=1, keepdims=True)
    var = jnp.maximum(jnp.mean(h * h, axis=1, keepdims=True) - mean * mean, 0.0)
    hb = (h - mean) * jax.lax.rsqrt(var + 1e-5) * model.gamma + model.beta
    m = mm(model.w1_f32, hb) + model.b1_f32[:, None]
    m = 0.5 * m * (1.0 + jax.lax.erf(m * _INV_SQRT2))
    m = mm(model.w2_f32, m) + model.b2_f32[:, None]
    hidden = hb + m
    y = mm(model.wf_f32, hidden) + model.bf_f32[:, None]
    return jnp.transpose(y.reshape(model.out_seg_num, B, D), (1, 0, 2))


if __name__ == "__main__":
    # Small shapes: batch=2, data_dim=4, in_len=18 (multiple of hop_len=3),
    # out_len=8, d_model=32.
    B, D, L_IN, L_OUT, D_MODEL = 2, 4, 18, 8, 32

    model = FrequencyPredictorPallas(data_dim=D, in_len=L_IN, out_len=L_OUT,
                                     hop_len=3, d_model=D_MODEL,
                                     key=jax.random.PRNGKey(0))

    x = jax.random.normal(jax.random.PRNGKey(0), (B, L_IN, D), dtype=jnp.float32)

    y = jax.block_until_ready(model(x))

    assert y.shape == (B, L_OUT, D), y.shape
    assert bool(jnp.all(jnp.isfinite(y)))

    # Tight check: reference emulating the kernel's bf16 MXU operands.
    y_bf = _reference(model, x, emulate_bf16=True)
    err_bf = float(jnp.max(jnp.abs(y - y_bf)))
    assert bool(jnp.allclose(y, y_bf, atol=5e-3, rtol=5e-3)), err_bf

    # Loose check: full-f32 reference (bounds the bf16 precision loss).
    y_f32 = _reference(model, x, emulate_bf16=False)
    err_f32 = float(jnp.max(jnp.abs(y - y_f32)))
    assert bool(jnp.allclose(y, y_f32, atol=5e-2, rtol=5e-2)), err_f32

    print("KERNEL_OK")
</pallas_src>

<mosaic_0001>
module attributes {stable_mosaic.version = 11 : i64} {
  func.func @_fused_kernel(%arg0: i32, %arg1: i32, %arg2: memref<18x128xbf16, #tpu.memory_space<vmem>>, %arg3: memref<32x18xbf16, #tpu.memory_space<vmem>>, %arg4: memref<72x32xbf16, #tpu.memory_space<vmem>>, %arg5: memref<32x8xf32, #tpu.memory_space<vmem>>, %arg6: memref<8x128xf32, #tpu.memory_space<vmem>>, %arg7: memref<32x1xf32, #tpu.memory_space<vmem>>, %arg8: memref<32x1xf32, #tpu.memory_space<vmem>>, %arg9: memref<32x1xf32, #tpu.memory_space<vmem>>, %arg10: memref<32x1xf32, #tpu.memory_space<vmem>>) attributes {dimension_semantics = [#tpu.dimension_semantics<arbitrary>, #tpu.dimension_semantics<arbitrary>], iteration_bounds = array<i64: 2, 1>, scalar_prefetch = 0 : i64, scratch_operands = 4 : i64, tpu.core_type = #tpu.core_type<tc>, window_params = [{transform_indices = @transform_0, window_bounds = array<i64: 18, 128>}, {pipeline_mode = #tpu.pipeline_mode<synchronous>, transform_indices = @transform_1, window_bounds = array<i64: 32, 18>}, {pipeline_mode = #tpu.pipeline_mode<synchronous>, transform_indices = @transform_2, window_bounds = array<i64: 72, 32>}, {pipeline_mode = #tpu.pipeline_mode<synchronous>, transform_indices = @transform_3, window_bounds = array<i64: 32, 8>}, {transform_indices = @transform_4, window_bounds = array<i64: 8, 128>}]} {
    %c0_i32 = arith.constant 0 : i32
    %0 = arith.cmpi eq, %arg0, %c0_i32 : i32
    %c0_i32_0 = arith.constant 0 : i32
    %1 = arith.cmpi eq, %arg1, %c0_i32_0 : i32
    %2 = arith.andi %0, %1 : i1
    %3 = arith.extui %2 : i1 to i32
    %c0_i32_1 = arith.constant 0 : i32
    %4 = arith.cmpi ne, %3, %c0_i32_1 : i32
    scf.if %4 {
      %cst_8 = arith.constant 0.000000e+00 : f32
      %14 = vector.broadcast %cst_8 : f32 to vector<32x1xf32>
      %c0_9 = arith.constant 0 : index
      %c0_10 = arith.constant 0 : index
      %15 = vector.load %arg7[%c0_9, %c0_10] : memref<32x1xf32, #tpu.memory_space<vmem>>, vector<32x1xf32>
      tpu.vector_store %arg7[%c0_9, %c0_10], %14 {strides = array<i32>} : memref<32x1xf32, #tpu.memory_space<vmem>>, vector<32x1xf32>,
      %cst_11 = arith.constant 0.000000e+00 : f32
      %16 = vector.broadcast %cst_11 : f32 to vector<32x1xf32>
      %c0_12 = arith.constant 0 : index
      %c0_13 = arith.constant 0 : index
      %17 = vector.load %arg8[%c0_12, %c0_13] : memref<32x1xf32, #tpu.memory_space<vmem>>, vector<32x1xf32>
      tpu.vector_store %arg8[%c0_12, %c0_13], %16 {strides = array<i32>} : memref<32x1xf32, #tpu.memory_space<vmem>>, vector<32x1xf32>,
    } else {
    }
    %c0 = arith.constant 0 : index
    %c0_2 = arith.constant 0 : index
    %5 = vector.load %arg3[%c0, %c0_2] : memref<32x18xbf16, #tpu.memory_space<vmem>>, vector<32x18xbf16>
    %c0_3 = arith.constant 0 : index
    %c0_4 = arith.constant 0 : index
    %6 = vector.load %arg2[%c0_3, %c0_4] : memref<18x128xbf16, #tpu.memory_space<vmem>>, vector<18x128xbf16>
    %cst = arith.constant dense<0.000000e+00> : vector<32x128xf32>
    %7 = tpu.matmul %5, %6, %cst {dimension_numbers = #tpu.dot_dimension_numbers<[1], [0], [0], [1], [0, 0, 1, 1], [], []>} : vector<32x18xbf16>, vector<18x128xbf16>, vector<32x128xf32> -> vector<32x128xf32>
    %c0_i32_5 = arith.constant 0 : i32
    %8 = arith.cmpi eq, %arg0, %c0_i32_5 : i32
    %9 = arith.extui %8 : i1 to i32
    %c0_i32_6 = arith.constant 0 : i32
    %10 = arith.cmpi ne, %9, %c0_i32_6 : i32
    scf.if %10 {
      %c0_8 = arith.constant 0 : index
      %c0_9 = arith.constant 0 : index
      %14 = vector.load %arg7[%c0_8, %c0_9] : memref<32x1xf32, #tpu.memory_space<vmem>>, vector<32x1xf32>
      %cst_10 = arith.constant dense<0.000000e+00> : vector<32xf32>
      %15 = vector.multi_reduction <add>, %7, %cst_10 [1] : vector<32x128xf32> to vector<32xf32>
      %16 = vector.shape_cast %15 : vector<32xf32> to vector<32x1xf32>
      %17 = arith.addf %14, %16 : vector<32x1xf32>
      %c0_11 = arith.constant 0 : index
      %c0_12 = arith.constant 0 : index
      %18 = vector.load %arg7[%c0_11, %c0_12] : memref<32x1xf32, #tpu.memory_space<vmem>>, vector<32x1xf32>
      tpu.vector_store %arg7[%c0_11, %c0_12], %17 {strides = array<i32>} : memref<32x1xf32, #tpu.memory_space<vmem>>, vector<32x1xf32>,
      %c0_13 = arith.constant 0 : index
      %c0_14 = arith.constant 0 : index
      %19 = vector.load %arg8[%c0_13, %c0_14] : memref<32x1xf32, #tpu.memory_space<vmem>>, vector<32x1xf32>
      %20 = arith.mulf %7, %7 : vector<32x128xf32>
      %cst_15 = arith.constant dense<0.000000e+00> : vector<32xf32>
      %21 = vector.multi_reduction <add>, %20, %cst_15 [1] : vector<32x128xf32> to vector<32xf32>
      %22 = vector.shape_cast %21 : vector<32xf32> to vector<32x1xf32>
      %23 = arith.addf %19, %22 : vector<32x1xf32>
      %c0_16 = arith.constant 0 : index
      %c0_17 = arith.constant 0 : index
      %24 = vector.load %arg8[%c0_16, %c0_17] : memref<32x1xf32, #tpu.memory_space<vmem>>, vector<32x1xf32>
      tpu.vector_store %arg8[%c0_16, %c0_17], %23 {strides = array<i32>} : memref<32x1xf32, #tpu.memory_space<vmem>>, vector<32x1xf32>,
    } else {
    }
    %c1_i32 = arith.constant 1 : i32
    %11 = arith.cmpi eq, %arg0, %c1_i32 : i32
    %12 = arith.extui %11 : i1 to i32
    %c0_i32_7 = arith.constant 0 : i32
    %13 = arith.cmpi ne, %12, %c0_i32_7 : i32
    scf.if %13 {
      %c0_i32_8 = arith.constant 0 : i32
      %14 = arith.cmpi eq, %arg1, %c0_i32_8 : i32
      %15 = arith.extui %14 : i1 to i32
      %c0_i32_9 = arith.constant 0 : i32
      %16 = arith.cmpi ne, %15, %c0_i32_9 : i32
      scf.if %16 {
        %c0_42 = arith.constant 0 : index
        %c0_43 = arith.constant 0 : index
        %84 = vector.load %arg7[%c0_42, %c0_43] : memref<32x1xf32, #tpu.memory_space<vmem>>, vector<32x1xf32>
        %cst_44 = arith.constant 1.250000e-01 : f32
        %85 = vector.broadcast %cst_44 : f32 to vector<32x1xf32>
        %86 = arith.mulf %84, %85 : vector<32x1xf32>
        %c0_45 = arith.constant 0 : index
        %c0_46 = arith.constant 0 : index
        %87 = vector.load %arg8[%c0_45, %c0_46] : memref<32x1xf32, #tpu.memory_space<vmem>>, vector<32x1xf32>
        %cst_47 = arith.constant 1.250000e-01 : f32
        %88 = vector.broadcast %cst_47 : f32 to vector<32x1xf32>
        %89 = arith.mulf %87, %88 : vector<32x1xf32>
        %90 = arith.mulf %86, %86 : vector<32x1xf32>
        %91 = arith.subf %89, %90 : vector<32x1xf32>
        %cst_48 = arith.constant 0.000000e+00 : f32
        %92 = vector.broadcast %cst_48 : f32 to vector<32x1xf32>
        %93 = arith.maximumf %91, %92 : vector<32x1xf32>
        %cst_49 = arith.constant 9.99999974E-6 : f32
        %94 = vector.broadcast %cst_49 : f32 to vector<32x1xf32>
        %95 = arith.addf %93, %94 : vector<32x1xf32>
        %96 = math.rsqrt %95 : vector<32x1xf32>
        %c0_50 = arith.constant 0 : index
        %c0_51 = arith.constant 0 : index
        %97 = vector.load %arg5[%c0_50, %c0_51] : memref<32x8xf32, #tpu.memory_space<vmem>>, vector<32x1xf32>
        %c0_52 = arith.constant 0 : index
        %c1 = arith.constant 1 : index
        %98 = vector.load %arg5[%c0_52, %c1] : memref<32x8xf32, #tpu.memory_space<vmem>>, vector<32x1xf32>
        %99 = arith.mulf %97, %96 : vector<32x1xf32>
        %c0_53 = arith.constant 0 : index
        %c0_54 = arith.constant 0 : index
        %100 = vector.load %arg9[%c0_53, %c0_54] : memref<32x1xf32, #tpu.memory_space<vmem>>, vector<32x1xf32>
        tpu.vector_store %arg9[%c0_53, %c0_54], %99 {strides = array<i32>} : memref<32x1xf32, #tpu.memory_space<vmem>>, vector<32x1xf32>,
        %101 = arith.mulf %86, %99 : vector<32x1xf32>
        %102 = arith.subf %98, %101 : vector<32x1xf32>
        %c0_55 = arith.constant 0 : index
        %c0_56 = arith.constant 0 : index
        %103 = vector.load %arg10[%c0_55, %c0_56] : memref<32x1xf32, #tpu.memory_space<vmem>>, vector<32x1xf32>
        tpu.vector_store %arg10[%c0_55, %c0_56], %102 {strides = array<i32>} : memref<32x1xf32, #tpu.memory_space<vmem>>, vector<32x1xf32>,
      } else {
      }
      %c0_10 = arith.constant 0 : index
      %c0_11 = arith.constant 0 : index
      %17 = vector.load %arg9[%c0_10, %c0_11] : memref<32x1xf32, #tpu.memory_space<vmem>>, vector<32x1xf32>
      %18 = vector.broadcast %17 : vector<32x1xf32> to vector<32x128xf32>
      %19 = arith.mulf %7, %18 : vector<32x128xf32>
      %c0_12 = arith.constant 0 : index
      %c0_13 = arith.constant 0 : index
      %20 = vector.load %arg10[%c0_12, %c0_13] : memref<32x1xf32, #tpu.memory_space<vmem>>, vector<32x1xf32>
      %21 = vector.broadcast %20 : vector<32x1xf32> to vector<32x128xf32>
      %22 = arith.addf %19, %21 : vector<32x128xf32>
      %c0_14 = arith.constant 0 : index
      %c0_15 = arith.constant 0 : index
      %23 = vector.load %arg4[%c0_14, %c0_15] : memref<72x32xbf16, #tpu.memory_space<vmem>>, vector<32x32xbf16>
      %c32 = arith.constant 32 : index
      %c0_16 = arith.constant 0 : index
      %24 = vector.load %arg4[%c32, %c0_16] : memref<72x32xbf16, #tpu.memory_space<vmem>>, vector<32x32xbf16>
      %c64 = arith.constant 64 : index
      %c0_17 = arith.constant 0 : index
      %25 = vector.load %arg4[%c64, %c0_17] : memref<72x32xbf16, #tpu.memory_space<vmem>>, vector<8x32xbf16>
      %c0_18 = arith.constant 0 : index
      %c2 = arith.constant 2 : index
      %26 = vector.load %arg5[%c0_18, %c2] : memref<32x8xf32, #tpu.memory_space<vmem>>, vector<32x1xf32>
      %c0_19 = arith.constant 0 : index
      %c3 = arith.constant 3 : index
      %27 = vector.load %arg5[%c0_19, %c3] : memref<32x8xf32, #tpu.memory_space<vmem>>, vector<32x1xf32>
      %c0_20 = arith.constant 0 : index
      %c4 = arith.constant 4 : index
      %28 = vector.load %arg5[%c0_20, %c4] : memref<32x8xf32, #tpu.memory_space<vmem>>, vector<8x1xf32>
      %29 = arith.truncf %22 : vector<32x128xf32> to vector<32x128xbf16>
      %cst_21 = arith.constant dense<0.000000e+00> : vector<32x128xf32>
      %30 = tpu.matmul %23, %29, %cst_21 {dimension_numbers = #tpu.dot_dimension_numbers<[1], [0], [0], [1], [0, 0, 1, 1], [], []>} : vector<32x32xbf16>, vector<32x128xbf16>, vector<32x128xf32> -> vector<32x128xf32>
      %31 = vector.broadcast %26 : vector<32x1xf32> to vector<32x128xf32>
      %32 = arith.addf %30, %31 : vector<32x128xf32>
      %cst_22 = arith.constant 0.707106769 : f32
      %33 = vector.broadcast %cst_22 : f32 to vector<32x128xf32>
      %34 = arith.mulf %32, %33 : vector<32x128xf32>
      %cst_23 = arith.constant 0.000000e+00 : f32
      %35 = vector.broadcast %cst_23 : f32 to vector<32x128xf32>
      %36 = arith.cmpf olt, %34, %35 : vector<32x128xf32>
      %cst_24 = arith.constant -1.000000e+00 : f32
      %cst_25 = arith.constant 1.000000e+00 : f32
      %37 = vector.broadcast %cst_24 : f32 to vector<32x128xf32>
      %38 = vector.broadcast %cst_25 : f32 to vector<32x128xf32>
      %39 = arith.select %36, %37, %38 : vector<32x128xi1>, vector<32x128xf32>
      %40 = math.absf %34 : vector<32x128xf32>
      %cst_26 = arith.constant 0.327591091 : f32
      %41 = vector.broadcast %cst_26 : f32 to vector<32x128xf32>
      %42 = arith.mulf %41, %40 : vector<32x128xf32>
      %cst_27 = arith.constant 1.000000e+00 : f32
      %43 = vector.broadcast %cst_27 : f32 to vector<32x128xf32>
      %44 = arith.addf %43, %42 : vector<32x128xf32>
      %cst_28 = arith.constant 1.000000e+00 : f32
      %45 = vector.broadcast %cst_28 : f32 to vector<32x128xf32>
      %46 = arith.divf %45, %44 : vector<32x128xf32>
      %cst_29 = arith.constant 1.06140542 : f32
      %47 = vector.broadcast %cst_29 : f32 to vector<32x128xf32>
      %48 = arith.mulf %47, %46 : vector<32x128xf32>
      %cst_30 = arith.constant 1.45315206 : f32
      %49 = vector.broadcast %cst_30 : f32 to vector<32x128xf32>
      %50 = arith.subf %48, %49 : vector<32x128xf32>
      %51 = arith.mulf %50, %46 : vector<32x128xf32>
      %cst_31 = arith.constant 1.42141378 : f32
      %52 = vector.broadcast %cst_31 : f32 to vector<32x128xf32>
      %53 = arith.addf %51, %52 : vector<32x128xf32>
      %54 = arith.mulf %53, %46 : vector<32x128xf32>
      %cst_32 = arith.constant 0.284496725 : f32
      %55 = vector.broadcast %cst_32 : f32 to vector<32x128xf32>
      %56 = arith.subf %54, %55 : vector<32x128xf32>
      %57 = arith.mulf %56, %46 : vector<32x128xf32>
      %cst_33 = arith.constant 0.254829586 : f32
      %58 = vector.broadcast %cst_33 : f32 to vector<32x128xf32>
      %59 = arith.addf %57, %58 : vector<32x128xf32>
      %60 = arith.mulf %59, %46 : vector<32x128xf32>
      %cst_34 = arith.constant 0.000000e+00 : f32
      %61 = vector.broadcast %cst_34 : f32 to vector<32x128xf32>
      %62 = arith.subf %61, %40 : vector<32x128xf32>
      %63 = arith.mulf %62, %40 : vector<32x128xf32>
      %64 = math.exp %63 : vector<32x128xf32>
      %65 = arith.mulf %60, %64 : vector<32x128xf32>
      %cst_35 = arith.constant 1.000000e+00 : f32
      %66 = vector.broadcast %cst_35 : f32 to vector<32x128xf32>
      %67 = arith.subf %66, %65 : vector<32x128xf32>
      %68 = arith.mulf %39, %67 : vector<32x128xf32>
      %cst_36 = arith.constant 5.000000e-01 : f32
      %69 = vector.broadcast %cst_36 : f32 to vector<32x128xf32>
      %70 = arith.mulf %69, %32 : vector<32x128xf32>
      %cst_37 = arith.constant 1.000000e+00 : f32
      %71 = vector.broadcast %cst_37 : f32 to vector<32x128xf32>
      %72 = arith.addf %71, %68 : vector<32x128xf32>
      %73 = arith.mulf %70, %72 : vector<32x128xf32>
      %74 = arith.truncf %73 : vector<32x128xf32> to vector<32x128xbf16>
      %cst_38 = arith.constant dense<0.000000e+00> : vector<32x128xf32>
      %75 = tpu.matmul %24, %74, %cst_38 {dimension_numbers = #tpu.dot_dimension_numbers<[1], [0], [0], [1], [0, 0, 1, 1], [], []>} : vector<32x32xbf16>, vector<32x128xbf16>, vector<32x128xf32> -> vector<32x128xf32>
      %76 = vector.broadcast %27 : vector<32x1xf32> to vector<32x128xf32>
      %77 = arith.addf %75, %76 : vector<32x128xf32>
      %78 = arith.addf %22, %77 : vector<32x128xf32>
      %79 = arith.truncf %78 : vector<32x128xf32> to vector<32x128xbf16>
      %cst_39 = arith.constant dense<0.000000e+00> : vector<8x128xf32>
      %80 = tpu.matmul %25, %79, %cst_39 {dimension_numbers = #tpu.dot_dimension_numbers<[1], [0], [0], [1], [0, 0, 1, 1], [], []>} : vector<8x32xbf16>, vector<32x128xbf16>, vector<8x128xf32> -> vector<8x128xf32>
      %81 = vector.broadcast %28 : vector<8x1xf32> to vector<8x128xf32>
      %82 = arith.addf %80, %81 : vector<8x128xf32>
      %c0_40 = arith.constant 0 : index
      %c0_41 = arith.constant 0 : index
      %83 = vector.load %arg6[%c0_40, %c0_41] : memref<8x128xf32, #tpu.memory_space<vmem>>, vector<8x128xf32>
      tpu.vector_store %arg6[%c0_40, %c0_41], %82 {strides = array<i32>} : memref<8x128xf32, #tpu.memory_space<vmem>>, vector<8x128xf32>,
    } else {
    }
    return
  }
  func.func @transform_0(%arg0: i32, %arg1: i32) -> (i32, i32) {
    %c0_i32 = arith.constant 0 : i32
    %c0_i32_0 = arith.constant 0 : i32
    return %c0_i32, %arg1 : i32, i32
  }
  func.func @transform_1(%arg0: i32, %arg1: i32) -> (i32, i32) {
    %c0_i32 = arith.constant 0 : i32
    %c0_i32_0 = arith.constant 0 : i32
    %c0_i32_1 = arith.constant 0 : i32
    return %c0_i32, %c0_i32_0 : i32, i32
  }
  func.func @transform_2(%arg0: i32, %arg1: i32) -> (i32, i32) {
    %c0_i32 = arith.constant 0 : i32
    %c0_i32_0 = arith.constant 0 : i32
    %c0_i32_1 = arith.constant 0 : i32
    return %c0_i32, %c0_i32_0 : i32, i32
  }
  func.func @transform_3(%arg0: i32, %arg1: i32) -> (i32, i32) {
    %c0_i32 = arith.constant 0 : i32
    %c0_i32_0 = arith.constant 0 : i32
    %c0_i32_1 = arith.constant 0 : i32
    return %c0_i32, %c0_i32_0 : i32, i32
  }
  func.func @transform_4(%arg0: i32, %arg1: i32) -> (i32, i32) {
    %0 = arith.muli %arg1, %arg0 : i32
    %c0_i32 = arith.constant 0 : i32
    %c0_i32_0 = arith.constant 0 : i32
    return %c0_i32, %0 : i32, i32
  }
}

</mosaic_0001>

<bundles_post_ra>
// kernel: tpu_custom_call.1
= control target key start
LH: loop header
LB: loop body
LE: loop exit
PB: predicated region body
PF: predicated region fallthrough
CT: control target
= control target key end

     0   :  { %9 = vsyncpa [#allocation7], 0  ;;  %s1410_s0 = inlined_call_operand.vmem [shape: bf16[18,128], index: 0, kind: input, shape index: {}]   ;;  %s1411_s1 = inlined_call_operand.vmem [shape: bf16[32,18], index: 1, kind: input, shape index: {}]   ;;  %s1412_s2 = inlined_call_operand.vmem [shape: bf16[72,32], index: 2, kind: input, shape index: {}]   ;;  %s1413_s3 = inlined_call_operand.vmem [shape: f32[32,8], index: 3, kind: input, shape index: {}]   ;;  %s1414_s4 = inlined_call_operand.hbm [shape: f32[8,128], index: 4, kind: output, shape index: {}]  }
   0x1   :  { %11 = vsyncpa [#allocation7 + $0x1], 0  ;;  %s1203_s15 = smov 0   ;;  %s1205_s16 = smov 0  }
   0x2   :  { %s1207_s17 = smov 0  }
   0x3 LB: > { %s945_s18 = sadd.s32 4294967295, %s1165_s17   ;;  %s946_s19 = sadd.s32 4294967294, %s1165_s17   ;;  %s1165_s17 = sphi %s1207_s17, %s17_s17   ;;  %s1161_s16 = sphi %s1205_s16, %s1417_s16   ;;  %s1157_s15 = sphi %s1203_s15, %s1416_s15  }
   0x4   : > { %s29_s20 = sadd.s32 1, %s1161_s16  ;;  %p949_p0 = scmp.ge.s32.totalorder %s1165_s17, 1 }
   0x5   : > { %p31_p1 = scmp.ge.s32.totalorder %s29_s20, 2  ;;  %p178_p2 = scmp.lt.s32.totalorder %s1165_s17, 3 }
   0x7   : > { %s1419_s20 = smov (%p31_p1, %s29_s20), 0  ;;  %p179_p3 = pnand %p949_p0, %p178_p2 }
   0x8   : > { %p209_p4 = scmp.eq.s32.totalorder (!%p179_p3), %s1157_s15, 0 }
   0x9   : > { %182 = sbr.rel (%p179_p3) target bundleno = 1477 (0x5c5), region = 36 }
   0xe   : > { %214 = sbr.rel (!%p209_p4) target bundleno = 19 (0x13), region = 40  ;;  %vm215_vm0 = vcmask (%p209_p4), 7168   ;;  %v1167_v0 = vmov (%p209_p4), 0.0  }
   0xf   : > { %216 = vst.msk [vmem:[#allocation2] sm:$0xff] (%p209_p4), %vm215_vm0, %v1167_v0  ;;  %217 = vst.msk [vmem:[#allocation2 + $0x8] sm:$0xff] (%p209_p4), %vm215_vm0, %v1167_v0 }
  0x10   : > { %218 = vst.msk [vmem:[#allocation2 + $0x10] sm:$0xff] (%p209_p4), %vm215_vm0, %v1167_v0  ;;  %219 = vst.msk [vmem:[#allocation2 + $0x18] sm:$0xff] (%p209_p4), %vm215_vm0, %v1167_v0 }
  0x11   : > { %220 = vst.msk [vmem:[#allocation3] sm:$0xff] (%p209_p4), %vm215_vm0, %v1167_v0  ;;  %221 = vst.msk [vmem:[#allocation3 + $0x8] sm:$0xff] (%p209_p4), %vm215_vm0, %v1167_v0 }
  0x12   : > { %222 = vst.msk [vmem:[#allocation3 + $0x10] sm:$0xff] (%p209_p4), %vm215_vm0, %v1167_v0  ;;  %223 = vst.msk [vmem:[#allocation3 + $0x18] sm:$0xff] (%p209_p4), %vm215_vm0, %v1167_v0 }
  0x13 PF: > { %v1075_v1 = vld [vmem:[%s1410_s0 + $0x8] ss:$0 sps:$4 sm:$0x11]   ;;  %vm257_vm1 = vcmask 1040384   ;;  %v1076_v2 = vld [vmem:[%s1410_s0] sm:$0xff]   ;;  %vm250_vm2 = vcmask 146432  }
  0x14   : > { %1028 = vmatprep.subr.msk.bf16.mxu0 %vm257_vm1, %v1075_v1  ;;  %v259_v3 = vsel %vm257_vm1, %v1075_v1, 0  ;;  %v1077_v4 = vld [vmem:[%s1411_s1] sm:$0xff]   ;;  %v1078_v5 = vld [vmem:[%s1411_s1 + $0x8] sm:$0xff]   ;;  %p957_p5 = scmp.ne.s32.totalorder %s1157_s15, 0 }
  0x15   : > { %997 = vmatpush3.bf16.msra.mxu0 %v259_v3  ;;  %1000 = vmatprep.mubr.msk.bf16.mxu0 %vm250_vm2, %v1077_v4 }
  0x16   : > { %998 = vmatprep.subr.bf16.mxu0 %v1076_v2 }
  0x19   : > { %999 = vmatpush3.bf16.msra.mxu0 %v1076_v2 }
  0x1c   : > { %1001 = vmatmul.mubr.msk.bf16.vlgmr.msra.gmra.mxu0 %vm250_vm2, %v1078_v5 }
  0xdc   : > { %v1238_v6 = vpop.f32.mrf.mxu0 }
  0xde   : > { %v1240_v7 = vpop.f32.mrf.mxu0  ;;  %312 = sbr.rel (%p957_p5) target bundleno = 380 (0x17c), region = 44 }
  0xe0   : > { %v1242_v8 = vpop.f32.mrf.mxu0 }
  0xe2   : > { %v1244_v9 = vpop.f32.mrf.mxu0 }
  0xe3   : > { %321 = vadd.xlane.f32.xlu1 %v1238_v6  ;;  %317 = vadd.xlane.f32.xlu0 %v1240_v7  ;;  %v339_v10 = vmul.f32 %v1244_v9, %v1244_v9  ;;  %v338_v11 = vmul.f32 %v1240_v7, %v1240_v7  ;;  %v341_v12 = vmul.f32 %v1242_v8, %v1242_v8  ;;  %v315_v14 = vld [vmem:[#allocation2 + $0x10] sm:$0xff]  ;;  %v313_v15 = vld [vmem:[#allocation2] sm:$0xff]  ;;  %vm329_vm3 = vcmask 7168   ;;  %v316_v20 = vld [vmem:[#allocation2 + $0x18] sm:$0xff] }
  0xe4   : > { %v340_v13 = vmul.f32 %v1238_v6, %v1238_v6  ;;  %v314_v21 = vld [vmem:[#allocation2 + $0x8] sm:$0xff]  ;;  %v334_v27 = vld [vmem:[#allocation3] sm:$0xff]  ;;  %v337_v32 = vld [vmem:[#allocation3 + $0x18] sm:$0xff] }
  0xe5   : > { %v335_v26 = vld [vmem:[#allocation3 + $0x8] sm:$0xff]  ;;  %v336_v33 = vld [vmem:[#allocation3 + $0x10] sm:$0xff] }
  0xe7   : > { %323 = vadd.xlane.f32.xlu1 %v1242_v8  ;;  %319 = vadd.xlane.f32.xlu0 %v1244_v9 }
  0xeb   : > { %344 = vadd.xlane.f32.xlu1 %v339_v10  ;;  %342 = vadd.xlane.f32.xlu0 %v338_v11 }
  0xef   : > { %348 = vadd.xlane.f32.xlu1 %v341_v12  ;;  %346 = vadd.xlane.f32.xlu0 %v340_v13 }
 0x16c   : > { %v322_v16 = vpop.xlane.xlu1 %321  ;;  %v318_v17 = vpop.xlane.xlu0 %317 }
 0x16d   : > { %v327_v18 = vadd.f32 %v322_v16, %v315_v14  ;;  %v325_v19 = vadd.f32 %v318_v17, %v313_v15 }
 0x16f   : > { %332 = vst.msk [vmem:[#allocation2 + $0x10] sm:$0xff] %vm329_vm3, %v327_v18  ;;  %330 = vst.msk [vmem:[#allocation2] sm:$0xff] %vm329_vm3, %v325_v19 }
 0x170   : > { %v324_v22 = vpop.xlane.xlu1 %323  ;;  %v320_v23 = vpop.xlane.xlu0 %319 }
 0x171   : > { %v328_v24 = vadd.f32 %v324_v22, %v316_v20  ;;  %v326_v25 = vadd.f32 %v320_v23, %v314_v21 }
 0x173   : > { %333 = vst.msk [vmem:[#allocation2 + $0x18] sm:$0xff] %vm329_vm3, %v328_v24  ;;  %331 = vst.msk [vmem:[#allocation2 + $0x8] sm:$0xff] %vm329_vm3, %v326_v25 }
 0x174   : > { %v345_v28 = vpop.xlane.xlu1 %344  ;;  %v343_v29 = vpop.xlane.xlu0 %342 }
 0x175   : > { %v351_v30 = vadd.f32 %v345_v28, %v335_v26  ;;  %v350_v31 = vadd.f32 %v343_v29, %v334_v27 }
 0x177   : > { %355 = vst.msk [vmem:[#allocation3 + $0x8] sm:$0xff] %vm329_vm3, %v351_v30  ;;  %354 = vst.msk [vmem:[#allocation3] sm:$0xff] %vm329_vm3, %v350_v31 }
 0x178   : > { %v349_v34 = vpop.xlane.xlu1 %348  ;;  %v347_v35 = vpop.xlane.xlu0 %346 }
 0x179   : > { %v353_v36 = vadd.f32 %v349_v34, %v337_v32  ;;  %v352_v37 = vadd.f32 %v347_v35, %v336_v33 }
 0x17b   : > { %357 = vst.msk [vmem:[#allocation3 + $0x18] sm:$0xff] %vm329_vm3, %v353_v36  ;;  %356 = vst.msk [vmem:[#allocation3 + $0x10] sm:$0xff] %vm329_vm3, %v352_v37 }
 0x17c PF: > { %p958_p6 = scmp.ne.s32.totalorder %s1157_s15, 1 }
 0x17d   : > { %s1169_s11 = smov (!%p958_p6), 1   ;;  %s1170_s12 = smov (!%p958_p6), 127  }
 0x17e   : > { %361 = sbr.rel (%p958_p6) target bundleno = 1464 (0x5b8), region = 48 }
 0x183   : > { %v367_v38 = vld [vmem:[#allocation2 + $0x10] sm:$0xff]  ;;  %v368_v42 = vld [vmem:[#allocation2 + $0x18] sm:$0xff]  ;;  %v365_v46 = vld [vmem:[#allocation2] sm:$0xff]  ;;  %vm409_vm4 = vcmask 7168   ;;  %v1168_v22 = vmov 0   ;;  %vm559_vm5 = vcmask 261120  }
 0x184   : > { %v375_v39 = vld [vmem:[#allocation3 + $0x10] sm:$0xff]  ;;  %v371_v40 = vmul.f32 0.125, %v367_v38  ;;  %v376_v43 = vld [vmem:[#allocation3 + $0x18] sm:$0xff]  ;;  %v372_v44 = vmul.f32 0.125, %v368_v42  ;;  %v373_v47 = vld [vmem:[#allocation3] sm:$0xff]  ;;  %v369_v49 = vmul.f32 0.125, %v365_v46  ;;  %1080 = vset.pattern.permute.xlu1 %v1168_v22  ;;  %1079 = vset.pattern.permute.xlu0 %v1168_v22 }
 0x185   : > { %v379_v41 = vmul.f32 0.125, %v375_v39  ;;  %v380_v45 = vmul.f32 0.125, %v376_v43  ;;  %v377_v50 = vmul.f32 0.125, %v373_v47  ;;  %v366_v51 = vld [vmem:[#allocation2 + $0x8] sm:$0xff]  ;;  %v1271_v10 = vld [vmem:[%s1413_s3 + $0x10] sm:$0xff]  ;;  %v1276_v11 = vld [vmem:[%s1413_s3 + $0x18] sm:$0xff] }
 0x186   : > { %v383_v48 = vmul.f32 %v371_v40, %v371_v40  ;;  %v374_v52 = vld [vmem:[#allocation3 + $0x8] sm:$0xff]  ;;  %v384_v53 = vmul.f32 %v372_v44, %v372_v44  ;;  %v370_v54 = vmul.f32 0.125, %v366_v51  ;;  %v381_v57 = vmul.f32 %v369_v49, %v369_v49  ;;  %v1281_v13 = vld [vmem:[%s1413_s3] sm:$0xff] }
 0x187   : > { %v378_v55 = vmul.f32 0.125, %v374_v52  ;;  %v1287_v16 = vld [vmem:[%s1413_s3 + $0x8] sm:$0xff]  ;;  %v1087_v47 = vld [vmem:[%s1412_s2] sm:$0xff]   ;;  %vm1175_vm10 = vmmov 0  }
 0x188   : > { %v387_v56 = vsub.f32 %v379_v41, %v383_v48  ;;  %v388_v58 = vsub.f32 %v380_v45, %v384_v53  ;;  %v382_v59 = vmul.f32 %v370_v54, %v370_v54  ;;  %v385_v61 = vsub.f32 %v377_v50, %v381_v57  ;;  %1008 = vmatprep.mubr.msk.bf16.mxu0 %vm559_vm5, %v1087_v47 }
 0x189   : > { %v1171_v48 = vmov 2  }
 0x18a   : > { %v391_v60 = vmax.f32 %v387_v56, 0.0  ;;  %v392_v62 = vmax.f32 %v388_v58, 0.0  ;;  %v386_v63 = vsub.f32 %v378_v55, %v382_v59  ;;  %v389_v1 = vmax.f32 %v385_v61, 0.0 }
 0x18c   : > { %v395_v0 = vadd.f32 1e-05, %v391_v60  ;;  %v396_v2 = vadd.f32 1e-05, %v392_v62  ;;  %v390_v3 = vmax.f32 %v386_v63, 0.0 }
 0x18d   : > { %v393_v4 = vadd.f32 1e-05, %v389_v1 }
 0x18e   : > { %1091 = vrsqrt.f32 %v395_v0  ;;  %v394_v5 = vadd.f32 1e-05, %v390_v3 }
 0x18f   : > { %1093 = vrsqrt.f32 %v396_v2 }
 0x190   : > { %1095 = vrsqrt.f32 %v393_v4 }
 0x191   : > { %1097 = vrsqrt.f32 %v394_v5 }
 0x19b   : > { %v1092_v12 = vpop.eup %1091 }
 0x19c   : > { %v1094_v14 = vpop.eup %1093  ;;  %v407_v15 = vmul.f32 %v1092_v12, %v1271_v10 }
 0x19d   : > { %v1096_v17 = vpop.eup %1095  ;;  %v408_v18 = vmul.f32 %v1094_v14, %v1276_v11 }
 0x19e   : > { %v1098_v19 = vpop.eup %1097  ;;  %v416_v20 = vmul.f32 %v407_v15, %v371_v40  ;;  %412 = vst.msk [vmem:[#allocation4 + $0x10] sm:$0xff] %vm409_vm4, %v407_v15  ;;  %v405_v21 = vmul.f32 %v1096_v17, %v1281_v13 }
 0x19f   : > { %413 = vst.msk [vmem:[#allocation4 + $0x18] sm:$0xff] %vm409_vm4, %v408_v18  ;;  %v406_v23 = vmul.f32 %v1098_v19, %v1287_v16  ;;  %v417_v24 = vmul.f32 %v408_v18, %v372_v44 }
 0x1a0   : > { %426 = vrot.lane.b32.xlu0 %v416_v20, %s1169_s11  ;;  %v414_v25 = vmul.f32 %v405_v21, %v369_v49  ;;  %410 = vst.msk [vmem:[#allocation4] sm:$0xff] %vm409_vm4, %v405_v21 }
 0x1a1   : > { %411 = vst.msk [vmem:[#allocation4 + $0x8] sm:$0xff] %vm409_vm4, %v406_v23  ;;  %v415_v26 = vmul.f32 %v406_v23, %v370_v54 }
 0x1a2   : > { %422 = vrot.lane.b32.xlu1 %v414_v25, %s1169_s11 }
 0x1a4   : > { %428 = vrot.lane.b32.xlu0 %v417_v24, %s1169_s11 }
 0x1a5   : > { %v460_v35 = vld [vmem:[#allocation4 + $0x10] sm:$0xff] }
 0x1a6   : > { %424 = vrot.lane.b32.xlu1 %v415_v26, %s1169_s11  ;;  %v461_v36 = vld [vmem:[#allocation4 + $0x18] sm:$0xff] }
 0x1a7   : > { %v458_v38 = vld [vmem:[#allocation4] sm:$0xff] }
 0x1a8   : > { %v459_v37 = vld [vmem:[#allocation4 + $0x8] sm:$0xff] }
 0x212   : > { %v427_v27 = vpop.permute.xlu0 %426 }
 0x213   : > { %v436_v28 = vsub.f32 %v1271_v10, %v427_v27 }
 0x214   : > { %v423_v29 = vpop.permute.xlu1 %422 }
 0x215   : > { %446 = vrot.lane.b32.xlu0 %v436_v28, %s1170_s12  ;;  %v434_v30 = vsub.f32 %v1281_v13, %v423_v29 }
 0x216   : > { %v429_v31 = vpop.permute.xlu0 %428 }
 0x217   : > { %v437_v32 = vsub.f32 %v1276_v11, %v429_v31 }
 0x218   : > { %v425_v33 = vpop.permute.xlu1 %424 }
 0x219   : > { %448 = vrot.lane.b32.xlu1 %v437_v32, %s1170_s12  ;;  %442 = vrot.lane.b32.xlu0 %v434_v30, %s1170_s12  ;;  %v435_v34 = vsub.f32 %v1287_v16, %v425_v33 }
 0x21d   : > { %444 = vrot.lane.b32.xlu1 %v435_v34, %s1170_s12  ;;  %474 = vperm.xlu0 %1079, %v460_v35  }
 0x221   : > { %479 = vperm.xlu1 %1080, %v461_v36   ;;  %469 = vperm.xlu0 %1079, %v459_v37  }
 0x225   : > { %464 = vperm.xlu1 %1080, %v458_v38  }
 0x287   : > { %v447_v39 = vpop.permute.xlu0 %446 }
 0x288   : > { %456 = vst.msk [vmem:[#allocation5 + $0x10] sm:$0xff] %vm409_vm4, %v447_v39 }
 0x28b   : > { %v443_v40 = vpop.permute.xlu0 %442  ;;  %v449_v41 = vpop.permute.xlu1 %448 }
 0x28c   : > { %454 = vst.msk [vmem:[#allocation5] sm:$0xff] %vm409_vm4, %v443_v40  ;;  %457 = vst.msk [vmem:[#allocation5 + $0x18] sm:$0xff] %vm409_vm4, %v449_v41 }
 0x28f   : > { %v445_v42 = vpop.permute.xlu1 %444  ;;  %v488_v43 = vld [vmem:[#allocation5 + $0x10] sm:$0xff] }
 0x290   : > { %455 = vst.msk [vmem:[#allocation5 + $0x8] sm:$0xff] %vm409_vm4, %v445_v42  ;;  %502 = vperm.xlu1 %1080, %v488_v43  }
 0x293   : > { %v489_v44 = vld [vmem:[#allocation5 + $0x18] sm:$0xff]  ;;  %v486_v45 = vld [vmem:[#allocation5] sm:$0xff] }
 0x294   : > { %507 = vperm.xlu0 %1079, %v489_v44   ;;  %492 = vperm.xlu1 %1080, %v486_v45  }
 0x297   : > { %v487_v46 = vld [vmem:[#allocation5 + $0x8] sm:$0xff] }
 0x298   : > { %497 = vperm.xlu0 %1079, %v487_v46   ;;  %1081 = vset.pattern.permute.xlu1 %v1171_v48  ;;  %v475_v50 = vpop.permute.xlu0 %474 }
 0x299   : > { %541 = vperm.xlu1 %1081, %v1271_v10   ;;  %v484_v54 = vmul.f32 %v1238_v6, %v475_v50 }
 0x29c   : > { %1082 = vset.pattern.permute.xlu0 %v1171_v48  ;;  %v480_v49 = vpop.permute.xlu1 %479  ;;  %v470_v52 = vpop.permute.xlu0 %469 }
 0x29d   : > { %546 = vperm.xlu0 %1082, %v1276_v11   ;;  %531 = vperm.xlu1 %1081, %v1281_v13   ;;  %v485_v55 = vmul.f32 %v1242_v8, %v480_v49  ;;  %v483_v60 = vmul.f32 %v470_v52, %v1244_v9  ;;  %v1088_v8 = vld [vmem:[%s1412_s2 + $0x8] sm:$0xff]   ;;  %v1172_v9 = vmov 3  }
 0x2a0   : > { %v465_v51 = vpop.permute.xlu1 %464 }
 0x2a1   : > { %536 = vperm.xlu1 %1081, %v1287_v16   ;;  %v482_v61 = vmul.f32 %v465_v51, %v1240_v7  ;;  %v1089_v7 = vld [vmem:[%s1412_s2 + $0x10] sm:$0xff]   ;;  %1083 = vset.pattern.permute.xlu0 %v1172_v9 }
 0x2a2   : > { %1016 = vmatprep.mubr.msk.bf16.mxu1 %vm559_vm5, %v1089_v7  ;;  %734 = vperm.xlu0 %1083, %v1271_v10  }
 0x2a5   : > { %1084 = vset.pattern.permute.xlu1 %v1172_v9 }
 0x2a6   : > { %738 = vperm.xlu1 %1084, %v1276_v11   ;;  %730 = vperm.xlu0 %1083, %v1287_v16  }
 0x2aa   : > { %726 = vperm.xlu1 %1084, %v1281_v13  }
 0x30b   : > { %v503_v53 = vpop.permute.xlu1 %502 }
 0x30c   : > { %v1314_v57 = vadd.f32 %v503_v53, %v484_v54 }
 0x30f   : > { %v508_v56 = vpop.permute.xlu0 %507  ;;  %v493_v59 = vpop.permute.xlu1 %492 }
 0x310   : > { %v1316_v58 = vadd.f32 %v508_v56, %v485_v55  ;;  %v1322_v0 = vadd.f32 %v493_v59, %v482_v61 }
 0x312   : > { %v528_v62 = vpack.c.bf16 %v1316_v58, %v1314_v57 }
 0x313   : > { %v498_v63 = vpop.permute.xlu0 %497 }
 0x314   : > { %v1324_v1 = vadd.f32 %v498_v63, %v483_v60  ;;  %1004 = vmatprep.subr.bf16.mxu0 %v528_v62  ;;  %v542_v2 = vpop.permute.xlu1 %541 }
 0x315   : > { %1005 = vmatpush3.bf16.msra.mxu0 %v528_v62 }
 0x316   : > { %v527_v6 = vpack.c.bf16 %v1324_v1, %v1322_v0 }
 0x318   : > { %1006 = vmatprep.subr.bf16.mxu0 %v527_v6  ;;  %v532_v4 = vpop.permute.xlu1 %531  ;;  %v547_v17 = vpop.permute.xlu0 %546 }
 0x319   : > { %1007 = vmatpush3.bf16.msra.mxu0 %v527_v6 }
 0x31c   : > { %1009 = vmatmul.mubr.msk.bf16.vlgmr.msra.gmra.mxu0 %vm559_vm5, %v1088_v8  ;;  %v537_v21 = vpop.permute.xlu1 %536 }
 0x3dc   : > { %v1010_v3 = vpop.f32.mrf.mxu0 }
 0x3dd   : > { %v1340_v5 = vadd.f32 %v1010_v3, %v542_v2 }
 0x3de   : > { %v600_v12 = vpop.f32.mrf.mxu0 }
 0x3df   : > { %v1343_v14 = vmul.f32 0.70710677, %v1340_v5  ;;  %v1345_v15 = vadd.f32 %v600_v12, %v532_v4 }
 0x3e0   : > { %v1011_v18 = vpop.f32.mrf.mxu0 }
 0x3e1   : > { %v629_v11 = vand.u32 2147483647, %v1343_v14  ;;  %v1349_v10 = vmul.f32 0.70710677, %v1345_v15  ;;  %v1351_v19 = vadd.f32 %v1011_v18, %v547_v17  ;;  %vm621_vm6 = vcmp.lt.f32.partialorder %v1343_v14, 0.0 }
 0x3e2   : > { %v603_v16 = vpop.f32.mrf.mxu0 }
 0x3e3   : > { %v633_v20 = vmul.f32 0.3275911, %v629_v11  ;;  %v627_v22 = vand.u32 2147483647, %v1349_v10  ;;  %v1355_v23 = vmul.f32 0.70710677, %v1351_v19  ;;  %v1357_v24 = vadd.f32 %v603_v16, %v537_v21 }
 0x3e4   : > { %v685_v34 = vsub.f32 0.0, %v629_v11  ;;  %vm619_vm7 = vcmp.lt.f32.partialorder %v1349_v10, 0.0  ;;  %v713_v10 = vmul.f32 0.5, %v1340_v5  ;;  %v1090_v5 = vld [vmem:[%s1412_s2 + $0x18] sm:$0xff]  }
 0x3e5   : > { %v637_v25 = vadd.f32 1.0, %v633_v20  ;;  %v631_v26 = vmul.f32 0.3275911, %v627_v22  ;;  %v630_v27 = vand.u32 2147483647, %v1355_v23  ;;  %v683_v36 = vsub.f32 0.0, %v627_v22 }
 0x3e6   : > { %v1361_v28 = vmul.f32 0.70710677, %v1357_v24  ;;  %v689_v37 = vmul.f32 %v685_v34, %v629_v11  ;;  %vm622_vm8 = vcmp.lt.f32.partialorder %v1355_v23, 0.0 }
 0x3e7   : > { %1099 = vrcp.f32 %v637_v25  ;;  %v635_v29 = vadd.f32 1.0, %v631_v26  ;;  %v634_v30 = vmul.f32 0.3275911, %v630_v27  ;;  %v686_v38 = vsub.f32 0.0, %v630_v27 }
 0x3e8   : > { %v628_v31 = vand.u32 2147483647, %v1361_v28  ;;  %v687_v40 = vmul.f32 %v683_v36, %v627_v22  ;;  %v695_v41 = vmul.f32 1.442695, %v689_v37  ;;  %vm620_vm9 = vcmp.lt.f32.partialorder %v1361_v28, 0.0 }
 0x3e9   : > { %1101 = vrcp.f32 %v635_v29  ;;  %v638_v32 = vadd.f32 1.0, %v634_v30  ;;  %v690_v44 = vmul.f32 %v686_v38, %v630_v27 }
 0x3ea   : > { %v632_v33 = vmul.f32 0.3275911, %v628_v31  ;;  %v684_v42 = vsub.f32 0.0, %v628_v31  ;;  %v691_v48 = vmul.f32 1.442695, %v687_v40 }
 0x3eb   : > { %1103 = vrcp.f32 %v638_v32  ;;  %v697_v53 = vmul.f32 1.442695, %v690_v44 }
 0x3ec   : > { %v636_v35 = vadd.f32 1.0, %v632_v33  ;;  %v688_v50 = vmul.f32 %v684_v42, %v628_v31 }
 0x3ee   : > { %1105 = vrcp.f32 %v636_v35  ;;  %v693_v62 = vmul.f32 1.442695, %v688_v50 }
 0x3ef   : > { %1107 = vpow2.f32 %v695_v41  ;;  %v1173_v41 = vmov 1.0  }
 0x3f0   : > { %1109 = vpow2.f32 %v691_v48  ;;  %v625_v42 = vsel %vm621_vm6, -1.0, %v1173_v41 }
 0x3f1   : > { %1111 = vpow2.f32 %v697_v53 }
 0x3f2   : > { %1113 = vpow2.f32 %v693_v62 }
 0x3f4   : > { %v1100_v39 = vpop.eup %1099 }
 0x3f5   : > { %v649_v43 = vmul.f32 1.0614054, %v1100_v39 }
 0x3f6   : > { %v1102_v45 = vpop.eup %1101 }
 0x3f7   : > { %v965_v46 = vadd.f32 -1.4531521, %v649_v43  ;;  %v647_v47 = vmul.f32 1.0614054, %v1102_v45 }
 0x3f8   : > { %v1104_v49 = vpop.eup %1103 }
 0x3f9   : > { %v657_v51 = vmul.f32 %v1100_v39, %v965_v46  ;;  %v963_v52 = vadd.f32 -1.4531521, %v647_v47  ;;  %v650_v54 = vmul.f32 1.0614054, %v1104_v49 }
 0x3fb   : > { %v661_v55 = vadd.f32 1.4214138, %v657_v51  ;;  %v1106_v56 = vpop.eup %1105  ;;  %v655_v59 = vmul.f32 %v1102_v45, %v963_v52  ;;  %v966_v60 = vadd.f32 -1.4531521, %v650_v54  ;;  %v626_v51 = vsel %vm622_vm8, -1.0, %v1173_v41 }
 0x3fc   : > { %v648_v61 = vmul.f32 1.0614054, %v1106_v56  ;;  %v1108_v26 = vpop.eup %1107 }
 0x3fd   : > { %v665_v63 = vmul.f32 %v1100_v39, %v661_v55  ;;  %v659_v6 = vadd.f32 1.4214138, %v655_v59  ;;  %v658_v8 = vmul.f32 %v1104_v49, %v966_v60  ;;  %v1110_v34 = vpop.eup %1109  ;;  %v714_v55 = vmul.f32 0.5, %v1351_v19 }
 0x3fe   : > { %v964_v7 = vadd.f32 -1.4531521, %v648_v61  ;;  %v1112_v40 = vpop.eup %1111  ;;  %v624_v59 = vsel %vm620_vm9, -1.0, %v1173_v41  ;;  %v1174_v19 = vmov 0.0  }
 0x3ff   : > { %v969_v9 = vadd.f32 -0.28449672, %v665_v63  ;;  %v663_v2 = vmul.f32 %v1102_v45, %v659_v6  ;;  %v662_v3 = vadd.f32 1.4214138, %v658_v8  ;;  %v1114_v14 = vpop.eup %1113  ;;  %v711_v63 = vmul.f32 0.5, %v1345_v15  ;;  %1020 = vmatprep.subr.bf16.mxu0 %v1174_v19  ;;  %1024 = vmatprep.mubr.msk.bf16.mxu0 %vm1175_vm10, %v1174_v19 }
 0x400   : > { %v656_v4 = vmul.f32 %v1106_v56, %v964_v7  ;;  %v712_v6 = vmul.f32 0.5, %v1357_v24  ;;  %v1176_v15 = vmov 4   ;;  %v739_v24 = vpop.permute.xlu1 %738 }
 0x401   : > { %v673_v12 = vmul.f32 %v1100_v39, %v969_v9  ;;  %v967_v17 = vadd.f32 -0.28449672, %v663_v2  ;;  %v666_v18 = vmul.f32 %v1104_v49, %v662_v3  ;;  %1085 = vset.pattern.permute.xlu1 %v1176_v15  ;;  %1086 = vset.pattern.permute.xlu0 %v1176_v15  ;;  %v735_v3 = vpop.permute.xlu0 %734 }
 0x402   : > { %v660_v11 = vadd.f32 1.4214138, %v656_v4  ;;  %813 = vperm.xlu1 %1085, %v1281_v13  }
 0x403   : > { %v677_v16 = vadd.f32 0.2548296, %v673_v12  ;;  %v671_v20 = vmul.f32 %v1102_v45, %v967_v17  ;;  %v970_v21 = vadd.f32 -0.28449672, %v666_v18 }
 0x404   : > { %v664_v22 = vmul.f32 %v1106_v56, %v660_v11  ;;  %v727_v18 = vpop.permute.xlu1 %726 }
 0x405   : > { %v681_v25 = vmul.f32 %v1100_v39, %v677_v16  ;;  %v675_v27 = vadd.f32 0.2548296, %v671_v20  ;;  %v674_v29 = vmul.f32 %v1104_v49, %v970_v21  ;;  %v731_v20 = vpop.permute.xlu0 %730 }
 0x406   : > { %v968_v30 = vadd.f32 -0.28449672, %v664_v22 }
 0x407   : > { %v701_v31 = vmul.f32 %v1108_v26, %v681_v25  ;;  %v679_v32 = vmul.f32 %v1102_v45, %v675_v27  ;;  %v678_v33 = vadd.f32 0.2548296, %v674_v29  ;;  %v623_v45 = vsel %vm619_vm7, -1.0, %v1173_v41 }
 0x408   : > { %v672_v35 = vmul.f32 %v1106_v56, %v968_v30 }
 0x409   : > { %v705_v36 = vsub.f32 1.0, %v701_v31  ;;  %v699_v37 = vmul.f32 %v1110_v34, %v679_v32  ;;  %v682_v38 = vmul.f32 %v1104_v49, %v678_v33  ;;  %v522_v32 = vld [vmem:[%s1412_s2 + $0x20] sm:$0xf] }
 0x40a   : > { %v676_v39 = vadd.f32 0.2548296, %v672_v35 }
 0x40b   : > { %v703_v43 = vsub.f32 1.0, %v699_v37  ;;  %v702_v44 = vmul.f32 %v1112_v40, %v682_v38  ;;  %v709_v46 = vmul.f32 %v705_v36, %v625_v42 }
 0x40c   : > { %v680_v47 = vmul.f32 %v1106_v56, %v676_v39 }
 0x40d   : > { %v706_v48 = vsub.f32 1.0, %v702_v44  ;;  %v707_v50 = vmul.f32 %v703_v43, %v623_v45  ;;  %v717_v53 = vadd.f32 1.0, %v709_v46 }
 0x40e   : > { %v700_v49 = vmul.f32 %v1114_v14, %v680_v47 }
 0x40f   : > { %v710_v52 = vmul.f32 %v706_v48, %v626_v51  ;;  %v715_v60 = vadd.f32 1.0, %v707_v50  ;;  %v721_v56 = vmul.f32 %v717_v53, %v713_v10 }
 0x410   : > { %v704_v54 = vsub.f32 1.0, %v700_v49 }
 0x411   : > { %v718_v23 = vadd.f32 1.0, %v710_v52  ;;  %v719_v7 = vmul.f32 %v715_v60, %v711_v63 }
 0x412   : > { %v708_v61 = vmul.f32 %v704_v54, %v624_v59 }
 0x413   : > { %v722_v62 = vmul.f32 %v718_v23, %v714_v55 }
 0x414   : > { %v716_v8 = vadd.f32 1.0, %v708_v61 }
 0x415   : > { %v724_v28 = vpack.c.bf16 %v722_v62, %v721_v56 }
 0x416   : > { %v720_v9 = vmul.f32 %v716_v8, %v712_v6 }
 0x417   : > { %1012 = vmatprep.subr.bf16.mxu1 %v724_v28 }
 0x418   : > { %1013 = vmatpush3.bf16.msra.mxu1 %v724_v28  ;;  %v723_v2 = vpack.c.bf16 %v720_v9, %v719_v7 }
 0x41a   : > { %1014 = vmatprep.subr.bf16.mxu1 %v723_v2 }
 0x41c   : > { %1015 = vmatpush3.bf16.msra.mxu1 %v723_v2 }
 0x41f   : > { %1017 = vmatmul.mubr.msk.bf16.vlgmr.msra.gmra.mxu1 %vm559_vm5, %v1090_v5 }
 0x4df   : > { %v1018_v4 = vpop.f32.mrf.mxu1 }
 0x4e0   : > { %v800_v17 = vadd.f32 %v1018_v4, %v735_v3 }
 0x4e1   : > { %v791_v12 = vpop.f32.mrf.mxu1 }
 0x4e2   : > { %v808_v22 = vadd.f32 %v800_v17, %v1314_v57  ;;  %v792_v25 = vadd.f32 %v791_v12, %v727_v18  ;;  %v814_v57 = vpop.permute.xlu1 %813 }
 0x4e3   : > { %v1019_v11 = vpop.f32.mrf.mxu1 }
 0x4e4   : > { %v803_v16 = vadd.f32 %v1019_v11, %v739_v24  ;;  %v806_v13 = vadd.f32 %v792_v25, %v1322_v0 }
 0x4e5   : > { %v794_v21 = vpop.f32.mrf.mxu1 }
 0x4e6   : > { %v809_v26 = vadd.f32 %v803_v16, %v1316_v58  ;;  %v795_v27 = vadd.f32 %v794_v21, %v731_v20 }
 0x4e8   : > { %v811_v29 = vpack.c.bf16 %v809_v26, %v808_v22  ;;  %v807_v30 = vadd.f32 %v795_v27, %v1324_v1 }
 0x4ea   : > { %1021 = vmatpush3.bf16.msra.mxu0 %v811_v29  ;;  %v810_v31 = vpack.c.bf16 %v807_v30, %v806_v13 }
 0x4eb   : > { %1022 = vmatprep.subr.bf16.mxu0 %v1174_v19 }
 0x4ee   : > { %1023 = vmatpush3.bf16.msra.mxu0 %v810_v31 }
 0x4f1   : > { %1025 = vmatmul.mubr.msk.bf16.vlgmr.msra.gmra.mxu0 %vm559_vm5, %v522_v32 }
 0x5b1   : > { %v853_v33 = vpop.f32.mrf.mxu0 }
 0x5b2   : > { %v854_v34 = vadd.f32 %v853_v33, %v814_v57 }
 0x5b3   : > { %v1026_v58 = vpop.f32.mrf.mxu0 }
 0x5b4   : > { %859 = vst [vmem:[#allocation6] sm:$0xff] %v854_v34 }
 0x5b5   : > { %v856_v35 = vpop.f32.mrf.mxu0 }
 0x5b7   : > { %v1027_v36 = vpop.f32.mrf.mxu0 }
 0x5b8 PF: > { %p1387_p7 = scmp.eq.s32.totalorder %s945_s18, 1  ;;  %s1177_s29 = smov [#allocation6]  }
 0x5b9   : > { %s875_s30 = sshll.u32 %s1177_s29, 4  ;;  %s876_s30 = int_to_ptr.vmem [resolvable:$true] %s875_s30 }
 0x5ba   : > { %s1115_s5 = scalar_lea.vmem %s876_s30, 128  ;;  %s1121_s6 = scalar_lea.vmem %s876_s30, 256 }
 0x5bb   : > { %p1116_p8 = scmp.ne.s32.totalorder %s876_s30, %s1115_s5  ;;  %p1122_p11 = scmp.lt.s32.totalorder %s876_s30, %s876_s30 }
 0x5bc   : > { %p1123_p12 = scmp.lt.s32.totalorder %s1121_s6, %s1115_s5 }
 0x5bd   : > { %p1117_p9 = pnand %p1116_p8, %p1387_p7 }
 0x5be   : > { %p1124_p13 = por %p1123_p12, %p1122_p11 }
 0x5bf   : > { %p1118_p10 = pneg %p1117_p9 }
 0x5c1   : > { %p1125_p0 = pnand %p1124_p13, %p1118_p10 }
 0x5c3   : > { %1128 = shalt.err (!%p1125_p0)
}
 0x5c4   : > { %1030 = dma.vmem_to_hbm [thread:$0]  (%p1387_p7), %s876_s30, 128, %s1414_s4, [#allocation7]  }
 0x5c5 PF: > { %p1038_p1 = scmp.ge.s32.totalorder %s1165_s17, 2  ;;  %p1039_p2 = scmp.eq.s32.totalorder %s946_s19, 1 }
 0x5c7   : > { %p1034_p3 = pnand %p1039_p2, %p1038_p1 }
 0x5c9   : > { %p1035_p4 = pneg %p1034_p3 }
 0x5cb   : > { %1152 = dma.done.wait (%p1035_p4), [#allocation7], 128  }
 0x5cc   : > { %1154 = vsyncadd (%p1035_p4), [#allocation7], 4294967168  ;;  %s17_s17 = sadd.s32 1, %s1165_s17   ;;  %s1416_s15 = smov %s1161_s16 }
 0x5cd   : > { %p14_p5 = scmp.ge.s32.totalorder %s17_s17, 4   ;;  %s1417_s16 = smov %s1419_s20 }
 0x5cf   :  { %16 = sbr.rel (!%p14_p5) target bundleno = 3 (0x3), region = 87 }
 0x5d4   :  { %893 = vsyncpa [#allocation7], 1 }
 0x5d5   :  { %895 = vsyncpa [#allocation7 + $0x1], 1 }

</bundles_post_ra>
